<compile_context>
chip_gen: v7x
topology: tpu7x:2x2x1
jax: 0.10.0
libtpu: 0.0.40
codegen_flags: <defaults>
</compile_context>

<pallas_src>
import functools

import jax
import jax.numpy as jnp
from jax import lax
from jax.experimental import pallas as pl
from jax.experimental.pallas import tpu as pltpu


def _round_up(a, b):
    return (a + b - 1) // b * b


# --------------------------------------------------------------------------
# Kernel
# --------------------------------------------------------------------------
def _decoder_kernel(*refs, nout, has_r):
    if has_r:
        (x_ref, r_ref, zb_ref,
         w0x_ref, w0r_ref,
         w1_ref, b1_ref, w2_ref, b2_ref, w3_ref, b3_ref,
         wh0_ref, bh0_ref, wh1_ref, bh1_ref,
         out_ref) = refs
    else:
        (x_ref, zb_ref,
         w0x_ref,
         w1_ref, b1_ref, w2_ref, b2_ref, w3_ref, b3_ref,
         wh0_ref, bh0_ref, wh1_ref, bh1_ref,
         out_ref) = refs
        r_ref = w0r_ref = None

    f32 = jnp.float32

    def mm(h, w_ref):
        # Cast to the weight dtype in-kernel (f32 or bf16); accumulate in f32.
        return jnp.dot(h.astype(w_ref.dtype), w_ref[...],
                       preferred_element_type=f32)

    x = x_ref[0]                                   # (tile_n, d_x)

    # ---- shared trunk: MLP(ninp, nhid, nhid, nlayers=3) -> 4 linears -------
    # zb = z @ W0z + b0 was folded in the wrapper; (1, nhid_p) row-broadcast.
    h = mm(x, w0x_ref) + zb_ref[0]
    if has_r:
        h = h + mm(r_ref[0], w0r_ref)
    h = jnp.maximum(h, 0.0)
    h = jnp.maximum(mm(h, w1_ref) + b1_ref[...], 0.0)
    h = jnp.maximum(mm(h, w2_ref) + b2_ref[...], 0.0)
    h = mm(h, w3_ref) + b3_ref[...]

    # ---- fused heads: ymean || ystd in one pair of matmuls -----------------
    hh = jnp.maximum(mm(h, wh0_ref) + bh0_ref[...], 0.0)    # (tile, 2*nhid_p)
    pre = mm(hh, wh1_ref) + bh1_ref[...]                    # (tile, out_p)

    # Columns [0, nout) = mu, [nout, 2*nout) = pre_sigma, rest = zero padding.
    col = lax.broadcasted_iota(jnp.int32, pre.shape, 1)
    is_sigma = jnp.logical_and(col >= nout, col < 2 * nout)
    # sigma = 0.1 + 0.9 * softplus(pre_sigma)  (numerically stable softplus)
    sp = jnp.maximum(pre, 0.0) + jnp.log1p(jnp.exp(-jnp.abs(pre)))
    out = jnp.where(is_sigma, 0.1 + 0.9 * sp, pre)

    out_ref[...] = out[None, :, :].astype(out_ref.dtype)


# --------------------------------------------------------------------------
# Parameter packing (pad nhid, fuse the two heads, split first layer)
# --------------------------------------------------------------------------
def pack_params(raw_params, d_x, nlatent, d_r, *, dtype=jnp.float32,
                hid_pad=128):
    """Raw torch-style params -> padded, head-fused kernel params (dict).

    Raw weights are stored as (in, out); first-layer rows are ordered
    [x | z | r], matching torch.cat((x_flat, cat(z_flat, r_flat)), dim=-1).

    dtype:   MXU compute dtype for the big weight matrices (jnp.bfloat16 on
             v6e/v7x); biases and the z-bias path stay f32.
    hid_pad: hidden-dim pad granularity.  128 fits the v5e MXU and small
             nhid; use 256 on v6e/v7x when 128 < nhid <= 256.
    """
    (w0, b0, w1, b1, w2, b2, w3, b3,
     wm0, bm0, wm1, bm1, ws0, bs0, ws1, bs1) = raw_params
    nhid = w0.shape[1]
    nout = wm1.shape[1]
    nhid_p = _round_up(nhid, hid_pad)
    out_p = _round_up(2 * nout, 128)

    def pad_w(w, rows, cols):
        out = jnp.zeros((rows, cols), jnp.float32)
        return out.at[:w.shape[0], :w.shape[1]].set(w)

    def pad_b(b, cols):
        out = jnp.zeros((1, cols), jnp.float32)
        return out.at[:, :b.shape[-1]].set(b.reshape(1, -1))

    # first trunk layer, split by feature group ([x | z | r] row order)
    w0x = pad_w(w0[:d_x], d_x, nhid_p)
    w0z = pad_w(w0[d_x:d_x + nlatent], nlatent, nhid_p)       # stays f32
    w0r = (pad_w(w0[d_x + nlatent:d_x + nlatent + d_r], d_r, nhid_p)
           if d_r > 0 else None)

    W1 = pad_w(w1, nhid_p, nhid_p)
    W2 = pad_w(w2, nhid_p, nhid_p)
    W3 = pad_w(w3, nhid_p, nhid_p)

    # fused head first layer: [wm0 | ws0]
    WH0 = jnp.zeros((nhid_p, 2 * nhid_p), jnp.float32)
    WH0 = WH0.at[:nhid, :nhid].set(wm0)
    WH0 = WH0.at[:nhid, nhid_p:nhid_p + nhid].set(ws0)
    bH0 = jnp.zeros((1, 2 * nhid_p), jnp.float32)
    bH0 = bH0.at[:, :nhid].set(bm0.reshape(1, -1))
    bH0 = bH0.at[:, nhid_p:nhid_p + nhid].set(bs0.reshape(1, -1))

    # fused head second layer: block-diagonal [wm1 ; ws1] -> lane-dense output
    WH1 = jnp.zeros((2 * nhid_p, out_p), jnp.float32)
    WH1 = WH1.at[:nhid, :nout].set(wm1)
    WH1 = WH1.at[nhid_p:nhid_p + nhid, nout:2 * nout].set(ws1)
    bH1 = jnp.zeros((1, out_p), jnp.float32)
    bH1 = bH1.at[:, :nout].set(bm1.reshape(1, -1))
    bH1 = bH1.at[:, nout:2 * nout].set(bs1.reshape(1, -1))

    cast = lambda w: w.astype(dtype)
    return {
        "w0x": cast(w0x),
        "w0r": None if w0r is None else cast(w0r),
        "w0z": w0z, "b0": pad_b(b0, nhid_p),    # f32: used for zb = z@W0z + b0
        "w1": cast(W1), "b1": pad_b(b1, nhid_p),
        "w2": cast(W2), "b2": pad_b(b2, nhid_p),
        "w3": cast(W3), "b3": pad_b(b3, nhid_p),
        "wh0": cast(WH0), "bh0": bH0,
        "wh1": cast(WH1), "bh1": bH1,
        "nout": nout, "nhid_p": nhid_p, "out_p": out_p,
        "d_x": d_x, "nlatent": nlatent, "d_r": d_r,
    }


# --------------------------------------------------------------------------
# Point-axis tile selection (minimize padding, keep >= 2 grid steps for v7x)
# --------------------------------------------------------------------------
def _choose_tile_n(n, batch, max_tile):
    max_tile = max(8, min(max_tile, _round_up(n, 8)))
    need_split = (batch == 1 and n > 8)        # keep both v7x cores busy
    best_key, best_t = None, 8
    for t in range(8, max_tile + 1, 8):
        n_pad = _round_up(n, t)
        steps = batch * (n_pad // t)
        key = (0 if (not need_split or steps >= 2) else 1,  # prefer >=2 steps
               n_pad - n,                                    # minimal padding
               -t)                                           # then largest tile
        if best_key is None or key < best_key:
            best_key, best_t = key, t
    return best_t


# --------------------------------------------------------------------------
# Wrapper
# --------------------------------------------------------------------------
def np_decoder_forward(x, z, r, packed, *, tile_n=512, out_dtype=jnp.float32):
    """x: (B, N, d_x), z: (B, nlatent), r: (B, N, d_r) or None.

    Returns (mu, sigma), each (B, N, nout)  -- the Normal's parameters.
    """
    B, N, d_x = x.shape
    nout, nhid_p, out_p = packed["nout"], packed["nhid_p"], packed["out_p"]
    assert (r is None) == (packed["w0r"] is None), \
        "presence of r must match the packed parameters"
    has_r = r is not None

    # Fold z into the first-layer bias (f32): zb = z @ W0z + b0 -> (B,1,nhid_p)
    zb = (z.astype(jnp.float32) @ packed["w0z"] + packed["b0"])[:, None, :]

    tile = _choose_tile_n(N, B, tile_n)
    n_pad = _round_up(N, tile)
    if n_pad != N:
        pad = ((0, 0), (0, n_pad - N), (0, 0))
        x = jnp.pad(x, pad)
        if has_r:
            r = jnp.pad(r, pad)
    d_r = r.shape[-1] if has_r else 0

    grid = (B, n_pad // tile)

    row_spec = lambda d: pl.BlockSpec((1, tile, d), lambda b, i: (b, i, 0))
    zb_spec = pl.BlockSpec((1, 1, nhid_p), lambda b, i: (b, 0, 0))
    # Constant operands: block index never changes -> single-buffer them.
    const_spec = lambda p: pl.BlockSpec(p.shape, lambda b, i: (0, 0),
                                        pipeline_mode=pl.Buffered(1))

    weight_names = (["w0x", "w0r"] if has_r else ["w0x"]) + \
        ["w1", "b1", "w2", "b2", "w3", "b3", "wh0", "bh0", "wh1", "bh1"]
    weights = [packed[k] for k in weight_names]

    inputs = ([x, r, zb] if has_r else [x, zb]) + weights
    in_specs = ([row_spec(d_x)] + ([row_spec(d_r)] if has_r else [])
                + [zb_spec] + [const_spec(w) for w in weights])

    # ---- advisory cost + explicit VMEM budget ------------------------------
    rows = B * n_pad
    flops_per_row = 2 * ((d_x + d_r) * nhid_p
                         + 3 * nhid_p * nhid_p
                         + nhid_p * 2 * nhid_p
                         + 2 * nhid_p * out_p)
    weight_bytes = sum(int(w.size) * w.dtype.itemsize for w in weights)
    out_itemsize = jnp.dtype(out_dtype).itemsize
    cost = pl.CostEstimate(
        flops=int(rows * flops_per_row),
        transcendentals=int(2 * rows * out_p),               # exp + log1p
        bytes_accessed=int(x.dtype.itemsize * rows * (d_x + d_r)
                           + 4 * B * nhid_p
                           + weight_bytes
                           + out_itemsize * rows * out_p))

    io_bytes = (2 * tile * (d_x + d_r) * x.dtype.itemsize    # x/r double-buffered
                + 2 * nhid_p * 4                             # zb
                + 2 * tile * out_p * out_itemsize)           # out double-buffered
    act_bytes = tile * (4 * nhid_p + out_p) * 4              # f32 intermediates
    vmem_limit = int(min(2 * (weight_bytes + io_bytes + act_bytes) + (8 << 20),
                         60 << 20))
    vmem_limit = max(vmem_limit, 16 << 20)

    out = pl.pallas_call(
        functools.partial(_decoder_kernel, nout=nout, has_r=has_r),
        out_shape=jax.ShapeDtypeStruct((B, n_pad, out_p), out_dtype),
        grid=grid,
        in_specs=in_specs,
        out_specs=row_spec(out_p),
        compiler_params=pltpu.CompilerParams(
            dimension_semantics=("parallel", "parallel"),
            vmem_limit_bytes=vmem_limit),
        cost_estimate=cost,
    )(*inputs)

    mu = out[:, :N, :nout]
    sigma = out[:, :N, nout:2 * nout]
    return mu, sigma


# --------------------------------------------------------------------------
# Synthetic params + pure-JAX reference
# --------------------------------------------------------------------------
def init_params(key, d_in, nhid, nout):
    """Deterministic synthetic parameters (weights stored as (in, out))."""
    def lin(k, nin, nou):
        kw, kb = jax.random.split(k)
        scale = 1.0 / jnp.sqrt(jnp.float32(nin))
        w = jax.random.uniform(kw, (nin, nou), jnp.float32, -scale, scale)
        b = jax.random.uniform(kb, (1, nou), jnp.float32, -scale, scale)
        return w, b

    ks = jax.random.split(key, 8)
    w0, b0 = lin(ks[0], d_in, nhid)
    w1, b1 = lin(ks[1], nhid, nhid)
    w2, b2 = lin(ks[2], nhid, nhid)
    w3, b3 = lin(ks[3], nhid, nhid)
    wm0, bm0 = lin(ks[4], nhid, nhid)
    wm1, bm1 = lin(ks[5], nhid, nout)
    ws0, bs0 = lin(ks[6], nhid, nhid)
    ws1, bs1 = lin(ks[7], nhid, nout)
    return (w0, b0, w1, b1, w2, b2, w3, b3,
            wm0, bm0, wm1, bm1, ws0, bs0, ws1, bs1)


def _reference_forward(x, z, r, raw_params):
    B, N, _ = x.shape
    z_rep = jnp.broadcast_to(z[:, None, :], (B, N, z.shape[-1]))
    feats = [x, z_rep] if r is None else [x, z_rep, r]
    h = jnp.concatenate(feats, axis=-1).reshape(B * N, -1)
    (w0, b0, w1, b1, w2, b2, w3, b3,
     wm0, bm0, wm1, bm1, ws0, bs0, ws1, bs1) = raw_params
    relu = lambda v: jnp.maximum(v, 0.0)
    h = relu(h @ w0 + b0)
    h = relu(h @ w1 + b1)
    h = relu(h @ w2 + b2)
    h = h @ w3 + b3
    mu = relu(h @ wm0 + bm0) @ wm1 + bm1
    ps = relu(h @ ws0 + bs0) @ ws1 + bs1
    sigma = 0.1 + 0.9 * jax.nn.softplus(ps)
    nout = mu.shape[-1]
    return mu.reshape(B, N, nout), sigma.reshape(B, N, nout)


if __name__ == "__main__":
    B, N = 2, 8                        # batch_size, npoints
    ninp_x, nlatent, nrep = 4, 3, 5
    nhid, nout = 32, 2

    key = jax.random.PRNGKey(0)
    kx, kz, kr, kp, kp2 = jax.random.split(key, 5)
    x = jax.random.normal(kx, (B, N, ninp_x), jnp.float32)
    z = jax.random.normal(kz, (B, nlatent), jnp.float32)
    r = jax.random.normal(kr, (B, N, nrep), jnp.float32)

    # --- path with deterministic representations r --------------------------
    raw = init_params(kp, ninp_x + nlatent + nrep, nhid, nout)
    packed = pack_params(raw, ninp_x, nlatent, nrep)  # dtype=jnp.bfloat16 on v6e/v7x
    mu, sigma = np_decoder_forward(x, z, r, packed)
    jax.block_until_ready((mu, sigma))

    mu_ref, sigma_ref = _reference_forward(x, z, r, raw)
    assert mu.shape == (B, N, nout) and sigma.shape == (B, N, nout)
    assert jnp.allclose(mu, mu_ref, atol=1e-4, rtol=1e-4)
    assert jnp.allclose(sigma, sigma_ref, atol=1e-4, rtol=1e-4)
    assert bool(jnp.all(sigma > 0.0))

    # --- stochastic-only path (r is None) ------------------------------------
    raw2 = init_params(kp2, ninp_x + nlatent, nhid, nout)
    packed2 = pack_params(raw2, ninp_x, nlatent, 0)
    mu2, sigma2 = np_decoder_forward(x, z, None, packed2)
    jax.block_until_ready((mu2, sigma2))

    mu2_ref, sigma2_ref = _reference_forward(x, z, None, raw2)
    assert jnp.allclose(mu2, mu2_ref, atol=1e-4, rtol=1e-4)
    assert jnp.allclose(sigma2, sigma2_ref, atol=1e-4, rtol=1e-4)
    assert bool(jnp.all(sigma2 > 0.0))

    print("KERNEL_OK")
</pallas_src>

<mosaic_0001>
module attributes {stable_mosaic.version = 11 : i64} {
  func.func @_decoder_kernel(%arg0: i32, %arg1: i32, %arg2: memref<1x8x4xf32, #tpu.memory_space<vmem>>, %arg3: memref<1x8x5xf32, #tpu.memory_space<vmem>>, %arg4: memref<1x1x128xf32, #tpu.memory_space<vmem>>, %arg5: memref<4x128xf32, #tpu.memory_space<vmem>>, %arg6: memref<5x128xf32, #tpu.memory_space<vmem>>, %arg7: memref<128x128xf32, #tpu.memory_space<vmem>>, %arg8: memref<1x128xf32, #tpu.memory_space<vmem>>, %arg9: memref<128x128xf32, #tpu.memory_space<vmem>>, %arg10: memref<1x128xf32, #tpu.memory_space<vmem>>, %arg11: memref<128x128xf32, #tpu.memory_space<vmem>>, %arg12: memref<1x128xf32, #tpu.memory_space<vmem>>, %arg13: memref<128x256xf32, #tpu.memory_space<vmem>>, %arg14: memref<1x256xf32, #tpu.memory_space<vmem>>, %arg15: memref<256x128xf32, #tpu.memory_space<vmem>>, %arg16: memref<1x128xf32, #tpu.memory_space<vmem>>, %arg17: memref<1x8x128xf32, #tpu.memory_space<vmem>>) attributes {dimension_semantics = [#tpu.dimension_semantics<parallel>, #tpu.dimension_semantics<parallel>], iteration_bounds = array<i64: 2, 1>, scalar_prefetch = 0 : i64, scratch_operands = 0 : i64, tpu.core_type = #tpu.core_type<tc>, window_params = [{transform_indices = @transform_0, window_bounds = array<i64: 1, 8, 4>}, {transform_indices = @transform_1, window_bounds = array<i64: 1, 8, 5>}, {transform_indices = @transform_2, window_bounds = array<i64: 1, 1, 128>}, {pipeline_mode = #tpu.pipeline_mode<synchronous>, transform_indices = @transform_3, window_bounds = array<i64: 4, 128>}, {pipeline_mode = #tpu.pipeline_mode<synchronous>, transform_indices = @transform_4, window_bounds = array<i64: 5, 128>}, {pipeline_mode = #tpu.pipeline_mode<synchronous>, transform_indices = @transform_5, window_bounds = array<i64: 128, 128>}, {pipeline_mode = #tpu.pipeline_mode<synchronous>, transform_indices = @transform_6, window_bounds = array<i64: 1, 128>}, {pipeline_mode = #tpu.pipeline_mode<synchronous>, transform_indices = @transform_7, window_bounds = array<i64: 128, 128>}, {pipeline_mode = #tpu.pipeline_mode<synchronous>, transform_indices = @transform_8, window_bounds = array<i64: 1, 128>}, {pipeline_mode = #tpu.pipeline_mode<synchronous>, transform_indices = @transform_9, window_bounds = array<i64: 128, 128>}, {pipeline_mode = #tpu.pipeline_mode<synchronous>, transform_indices = @transform_10, window_bounds = array<i64: 1, 128>}, {pipeline_mode = #tpu.pipeline_mode<synchronous>, transform_indices = @transform_11, window_bounds = array<i64: 128, 256>}, {pipeline_mode = #tpu.pipeline_mode<synchronous>, transform_indices = @transform_12, window_bounds = array<i64: 1, 256>}, {pipeline_mode = #tpu.pipeline_mode<synchronous>, transform_indices = @transform_13, window_bounds = array<i64: 256, 128>}, {pipeline_mode = #tpu.pipeline_mode<synchronous>, transform_indices = @transform_14, window_bounds = array<i64: 1, 128>}, {transform_indices = @transform_15, window_bounds = array<i64: 1, 8, 128>}]} {
    %c0 = arith.constant 0 : index
    %c0_0 = arith.constant 0 : index
    %c0_1 = arith.constant 0 : index
    %0 = vector.load %arg2[%c0, %c0_0, %c0_1] : memref<1x8x4xf32, #tpu.memory_space<vmem>>, vector<1x8x4xf32>
    %1 = vector.shape_cast %0 : vector<1x8x4xf32> to vector<8x4xf32>
    %c0_2 = arith.constant 0 : index
    %c0_3 = arith.constant 0 : index
    %2 = vector.load %arg5[%c0_2, %c0_3] : memref<4x128xf32, #tpu.memory_space<vmem>>, vector<4x128xf32>
    %cst = arith.constant dense<0.000000e+00> : vector<8x128xf32>
    %3 = tpu.matmul %1, %2, %cst {dimension_numbers = #tpu.dot_dimension_numbers<[1], [0], [0], [1], [0, 0, 1, 1], [], []>} : vector<8x4xf32>, vector<4x128xf32>, vector<8x128xf32> -> vector<8x128xf32>
    %c0_4 = arith.constant 0 : index
    %c0_5 = arith.constant 0 : index
    %c0_6 = arith.constant 0 : index
    %4 = vector.load %arg4[%c0_4, %c0_5, %c0_6] : memref<1x1x128xf32, #tpu.memory_space<vmem>>, vector<1x1x128xf32>
    %5 = vector.shape_cast %4 : vector<1x1x128xf32> to vector<1x128xf32>
    %6 = vector.broadcast %5 : vector<1x128xf32> to vector<8x128xf32>
    %7 = arith.addf %3, %6 : vector<8x128xf32>
    %c0_7 = arith.constant 0 : index
    %c0_8 = arith.constant 0 : index
    %c0_9 = arith.constant 0 : index
    %8 = vector.load %arg3[%c0_7, %c0_8, %c0_9] : memref<1x8x5xf32, #tpu.memory_space<vmem>>, vector<1x8x5xf32>
    %9 = vector.shape_cast %8 : vector<1x8x5xf32> to vector<8x5xf32>
    %c0_10 = arith.constant 0 : index
    %c0_11 = arith.constant 0 : index
    %10 = vector.load %arg6[%c0_10, %c0_11] : memref<5x128xf32, #tpu.memory_space<vmem>>, vector<5x128xf32>
    %cst_12 = arith.constant dense<0.000000e+00> : vector<8x128xf32>
    %11 = tpu.matmul %9, %10, %cst_12 {dimension_numbers = #tpu.dot_dimension_numbers<[1], [0], [0], [1], [0, 0, 1, 1], [], []>} : vector<8x5xf32>, vector<5x128xf32>, vector<8x128xf32> -> vector<8x128xf32>
    %12 = arith.addf %7, %11 : vector<8x128xf32>
    %cst_13 = arith.constant 0.000000e+00 : f32
    %13 = vector.broadcast %cst_13 : f32 to vector<8x128xf32>
    %14 = arith.maximumf %12, %13 : vector<8x128xf32>
    %c0_14 = arith.constant 0 : index
    %c0_15 = arith.constant 0 : index
    %15 = vector.load %arg7[%c0_14, %c0_15] : memref<128x128xf32, #tpu.memory_space<vmem>>, vector<128x128xf32>
    %cst_16 = arith.constant dense<0.000000e+00> : vector<8x128xf32>
    %16 = tpu.matmul %14, %15, %cst_16 {dimension_numbers = #tpu.dot_dimension_numbers<[1], [0], [0], [1], [0, 0, 1, 1], [], []>} : vector<8x128xf32>, vector<128x128xf32>, vector<8x128xf32> -> vector<8x128xf32>
    %c0_17 = arith.constant 0 : index
    %c0_18 = arith.constant 0 : index
    %17 = vector.load %arg8[%c0_17, %c0_18] : memref<1x128xf32, #tpu.memory_space<vmem>>, vector<1x128xf32>
    %18 = vector.broadcast %17 : vector<1x128xf32> to vector<8x128xf32>
    %19 = arith.addf %16, %18 : vector<8x128xf32>
    %cst_19 = arith.constant 0.000000e+00 : f32
    %20 = vector.broadcast %cst_19 : f32 to vector<8x128xf32>
    %21 = arith.maximumf %19, %20 : vector<8x128xf32>
    %c0_20 = arith.constant 0 : index
    %c0_21 = arith.constant 0 : index
    %22 = vector.load %arg9[%c0_20, %c0_21] : memref<128x128xf32, #tpu.memory_space<vmem>>, vector<128x128xf32>
    %cst_22 = arith.constant dense<0.000000e+00> : vector<8x128xf32>
    %23 = tpu.matmul %21, %22, %cst_22 {dimension_numbers = #tpu.dot_dimension_numbers<[1], [0], [0], [1], [0, 0, 1, 1], [], []>} : vector<8x128xf32>, vector<128x128xf32>, vector<8x128xf32> -> vector<8x128xf32>
    %c0_23 = arith.constant 0 : index
    %c0_24 = arith.constant 0 : index
    %24 = vector.load %arg10[%c0_23, %c0_24] : memref<1x128xf32, #tpu.memory_space<vmem>>, vector<1x128xf32>
    %25 = vector.broadcast %24 : vector<1x128xf32> to vector<8x128xf32>
    %26 = arith.addf %23, %25 : vector<8x128xf32>
    %cst_25 = arith.constant 0.000000e+00 : f32
    %27 = vector.broadcast %cst_25 : f32 to vector<8x128xf32>
    %28 = arith.maximumf %26, %27 : vector<8x128xf32>
    %c0_26 = arith.constant 0 : index
    %c0_27 = arith.constant 0 : index
    %29 = vector.load %arg11[%c0_26, %c0_27] : memref<128x128xf32, #tpu.memory_space<vmem>>, vector<128x128xf32>
    %cst_28 = arith.constant dense<0.000000e+00> : vector<8x128xf32>
    %30 = tpu.matmul %28, %29, %cst_28 {dimension_numbers = #tpu.dot_dimension_numbers<[1], [0], [0], [1], [0, 0, 1, 1], [], []>} : vector<8x128xf32>, vector<128x128xf32>, vector<8x128xf32> -> vector<8x128xf32>
    %c0_29 = arith.constant 0 : index
    %c0_30 = arith.constant 0 : index
    %31 = vector.load %arg12[%c0_29, %c0_30] : memref<1x128xf32, #tpu.memory_space<vmem>>, vector<1x128xf32>
    %32 = vector.broadcast %31 : vector<1x128xf32> to vector<8x128xf32>
    %33 = arith.addf %30, %32 : vector<8x128xf32>
    %c0_31 = arith.constant 0 : index
    %c0_32 = arith.constant 0 : index
    %34 = vector.load %arg13[%c0_31, %c0_32] : memref<128x256xf32, #tpu.memory_space<vmem>>, vector<128x256xf32>
    %cst_33 = arith.constant dense<0.000000e+00> : vector<8x256xf32>
    %35 = tpu.matmul %33, %34, %cst_33 {dimension_numbers = #tpu.dot_dimension_numbers<[1], [0], [0], [1], [0, 0, 1, 1], [], []>} : vector<8x128xf32>, vector<128x256xf32>, vector<8x256xf32> -> vector<8x256xf32>
    %c0_34 = arith.constant 0 : index
    %c0_35 = arith.constant 0 : index
    %36 = vector.load %arg14[%c0_34, %c0_35] : memref<1x256xf32, #tpu.memory_space<vmem>>, vector<1x256xf32>
    %37 = vector.broadcast %36 : vector<1x256xf32> to vector<8x256xf32>
    %38 = arith.addf %35, %37 : vector<8x256xf32>
    %cst_36 = arith.constant 0.000000e+00 : f32
    %39 = vector.broadcast %cst_36 : f32 to vector<8x256xf32>
    %40 = arith.maximumf %38, %39 : vector<8x256xf32>
    %c0_37 = arith.constant 0 : index
    %c0_38 = arith.constant 0 : index
    %41 = vector.load %arg15[%c0_37, %c0_38] : memref<256x128xf32, #tpu.memory_space<vmem>>, vector<256x128xf32>
    %cst_39 = arith.constant dense<0.000000e+00> : vector<8x128xf32>
    %42 = tpu.matmul %40, %41, %cst_39 {dimension_numbers = #tpu.dot_dimension_numbers<[1], [0], [0], [1], [0, 0, 1, 1], [], []>} : vector<8x256xf32>, vector<256x128xf32>, vector<8x128xf32> -> vector<8x128xf32>
    %c0_40 = arith.constant 0 : index
    %c0_41 = arith.constant 0 : index
    %43 = vector.load %arg16[%c0_40, %c0_41] : memref<1x128xf32, #tpu.memory_space<vmem>>, vector<1x128xf32>
    %44 = vector.broadcast %43 : vector<1x128xf32> to vector<8x128xf32>
    %45 = arith.addf %42, %44 : vector<8x128xf32>
    %46 = tpu.iota {dimensions = array<i32: 1>} : vector<8x128xi32>
    %c2_i32 = arith.constant 2 : i32
    %47 = vector.broadcast %c2_i32 : i32 to vector<8x128xi32>
    %48 = arith.cmpi sge, %46, %47 : vector<8x128xi32>
    %c4_i32 = arith.constant 4 : i32
    %49 = vector.broadcast %c4_i32 : i32 to vector<8x128xi32>
    %50 = arith.cmpi slt, %46, %49 : vector<8x128xi32>
    %51 = arith.andi %48, %50 : vector<8x128xi1>
    %cst_42 = arith.constant 0.000000e+00 : f32
    %52 = vector.broadcast %cst_42 : f32 to vector<8x128xf32>
    %53 = arith.maximumf %45, %52 : vector<8x128xf32>
    %54 = math.absf %45 : vector<8x128xf32>
    %cst_43 = arith.constant 0.000000e+00 : f32
    %55 = vector.broadcast %cst_43 : f32 to vector<8x128xf32>
    %56 = arith.subf %55, %54 : vector<8x128xf32>
    %57 = math.exp %56 : vector<8x128xf32>
    %58 = math.log1p %57 : vector<8x128xf32>
    %59 = arith.addf %53, %58 : vector<8x128xf32>
    %cst_44 = arith.constant 0.899999976 : f32
    %60 = vector.broadcast %cst_44 : f32 to vector<8x128xf32>
    %61 = arith.mulf %60, %59 : vector<8x128xf32>
    %cst_45 = arith.constant 1.000000e-01 : f32
    %62 = vector.broadcast %cst_45 : f32 to vector<8x128xf32>
    %63 = arith.addf %62, %61 : vector<8x128xf32>
    %64 = arith.select %51, %63, %45 : vector<8x128xi1>, vector<8x128xf32>
    %65 = vector.shape_cast %64 : vector<8x128xf32> to vector<1x8x128xf32>
    %c0_46 = arith.constant 0 : index
    %c0_47 = arith.constant 0 : index
    %c0_48 = arith.constant 0 : index
    %66 = vector.load %arg17[%c0_46, %c0_47, %c0_48] : memref<1x8x128xf32, #tpu.memory_space<vmem>>, vector<1x8x128xf32>
    tpu.vector_store %arg17[%c0_46, %c0_47, %c0_48], %65 {strides = array<i32>} : memref<1x8x128xf32, #tpu.memory_space<vmem>>, vector<1x8x128xf32>,
    return
  }
  func.func @transform_0(%arg0: i32, %arg1: i32) -> (i32, i32, i32) {
    %c0_i32 = arith.constant 0 : i32
    %c0_i32_0 = arith.constant 0 : i32
    return %arg0, %arg1, %c0_i32 : i32, i32, i32
  }
  func.func @transform_1(%arg0: i32, %arg1: i32) -> (i32, i32, i32) {
    %c0_i32 = arith.constant 0 : i32
    %c0_i32_0 = arith.constant 0 : i32
    return %arg0, %arg1, %c0_i32 : i32, i32, i32
  }
  func.func @transform_2(%arg0: i32, %arg1: i32) -> (i32, i32, i32) {
    %c0_i32 = arith.constant 0 : i32
    %c0_i32_0 = arith.constant 0 : i32
    %c0_i32_1 = arith.constant 0 : i32
    return %arg0, %c0_i32, %c0_i32_0 : i32, i32, i32
  }
  func.func @transform_3(%arg0: i32, %arg1: i32) -> (i32, i32) {
    %c0_i32 = arith.constant 0 : i32
    %c0_i32_0 = arith.constant 0 : i32
    %c0_i32_1 = arith.constant 0 : i32
    return %c0_i32, %c0_i32_0 : i32, i32
  }
  func.func @transform_4(%arg0: i32, %arg1: i32) -> (i32, i32) {
    %c0_i32 = arith.constant 0 : i32
    %c0_i32_0 = arith.constant 0 : i32
    %c0_i32_1 = arith.constant 0 : i32
    return %c0_i32, %c0_i32_0 : i32, i32
  }
  func.func @transform_5(%arg0: i32, %arg1: i32) -> (i32, i32) {
    %c0_i32 = arith.constant 0 : i32
    %c0_i32_0 = arith.constant 0 : i32
    %c0_i32_1 = arith.constant 0 : i32
    return %c0_i32, %c0_i32_0 : i32, i32
  }
  func.func @transform_6(%arg0: i32, %arg1: i32) -> (i32, i32) {
    %c0_i32 = arith.constant 0 : i32
    %c0_i32_0 = arith.constant 0 : i32
    %c0_i32_1 = arith.constant 0 : i32
    return %c0_i32, %c0_i32_0 : i32, i32
  }
  func.func @transform_7(%arg0: i32, %arg1: i32) -> (i32, i32) {
    %c0_i32 = arith.constant 0 : i32
    %c0_i32_0 = arith.constant 0 : i32
    %c0_i32_1 = arith.constant 0 : i32
    return %c0_i32, %c0_i32_0 : i32, i32
  }
  func.func @transform_8(%arg0: i32, %arg1: i32) -> (i32, i32) {
    %c0_i32 = arith.constant 0 : i32
    %c0_i32_0 = arith.constant 0 : i32
    %c0_i32_1 = arith.constant 0 : i32
    return %c0_i32, %c0_i32_0 : i32, i32
  }
  func.func @transform_9(%arg0: i32, %arg1: i32) -> (i32, i32) {
    %c0_i32 = arith.constant 0 : i32
    %c0_i32_0 = arith.constant 0 : i32
    %c0_i32_1 = arith.constant 0 : i32
    return %c0_i32, %c0_i32_0 : i32, i32
  }
  func.func @transform_10(%arg0: i32, %arg1: i32) -> (i32, i32) {
    %c0_i32 = arith.constant 0 : i32
    %c0_i32_0 = arith.constant 0 : i32
    %c0_i32_1 = arith.constant 0 : i32
    return %c0_i32, %c0_i32_0 : i32, i32
  }
  func.func @transform_11(%arg0: i32, %arg1: i32) -> (i32, i32) {
    %c0_i32 = arith.constant 0 : i32
    %c0_i32_0 = arith.constant 0 : i32
    %c0_i32_1 = arith.constant 0 : i32
    return %c0_i32, %c0_i32_0 : i32, i32
  }
  func.func @transform_12(%arg0: i32, %arg1: i32) -> (i32, i32) {
    %c0_i32 = arith.constant 0 : i32
    %c0_i32_0 = arith.constant 0 : i32
    %c0_i32_1 = arith.constant 0 : i32
    return %c0_i32, %c0_i32_0 : i32, i32
  }
  func.func @transform_13(%arg0: i32, %arg1: i32) -> (i32, i32) {
    %c0_i32 = arith.constant 0 : i32
    %c0_i32_0 = arith.constant 0 : i32
    %c0_i32_1 = arith.constant 0 : i32
    return %c0_i32, %c0_i32_0 : i32, i32
  }
  func.func @transform_14(%arg0: i32, %arg1: i32) -> (i32, i32) {
    %c0_i32 = arith.constant 0 : i32
    %c0_i32_0 = arith.constant 0 : i32
    %c0_i32_1 = arith.constant 0 : i32
    return %c0_i32, %c0_i32_0 : i32, i32
  }
  func.func @transform_15(%arg0: i32, %arg1: i32) -> (i32, i32, i32) {
    %c0_i32 = arith.constant 0 : i32
    %c0_i32_0 = arith.constant 0 : i32
    return %arg0, %arg1, %c0_i32 : i32, i32, i32
  }
}

</mosaic_0001>

<bundles_post_ra>
// kernel: tpu_custom_call.1
= control target key start
LH: loop header
LB: loop body
LE: loop exit
PB: predicated region body
PF: predicated region fallthrough
CT: control target
= control target key end

     0   :  { %s2632_s0 = inlined_call_operand.vmem [shape: f32[2,8,4], index: 0, kind: input, shape index: {}]   ;;  %s2633_s1 = inlined_call_operand.vmem [shape: f32[2,8,5], index: 1, kind: input, shape index: {}]   ;;  %s2634_s2 = inlined_call_operand.vmem [shape: f32[2,1,128], index: 2, kind: input, shape index: {}]   ;;  %s2635_s3 = inlined_call_operand.vmem [shape: f32[4,128], index: 3, kind: input, shape index: {}]   ;;  %s2636_s4 = inlined_call_operand.vmem [shape: f32[5,128], index: 4, kind: input, shape index: {}]   ;;  %s2637_s5 = inlined_call_operand.hbm [shape: f32[128,128], index: 5, kind: input, shape index: {}]   ;;  %s2638_s6 = inlined_call_operand.vmem [shape: f32[1,128], index: 6, kind: input, shape index: {}]   ;;  %s2639_s7 = inlined_call_operand.hbm [shape: f32[128,128], index: 7, kind: input, shape index: {}]   ;;  %s2640_s8 = inlined_call_operand.vmem [shape: f32[1,128], index: 8, kind: input, shape index: {}]   ;;  %s2641_s9 = inlined_call_operand.hbm [shape: f32[128,128], index: 9, kind: input, shape index: {}]   ;;  %s2642_s10 = inlined_call_operand.vmem [shape: f32[1,128], index: 10, kind: input, shape index: {}]   ;;  %s2643_s11 = inlined_call_operand.hbm [shape: f32[128,256], index: 11, kind: input, shape index: {}]   ;;  %s2644_s12 = inlined_call_operand.vmem [shape: f32[1,256], index: 12, kind: input, shape index: {}]   ;;  %s2645_s13 = inlined_call_operand.hbm [shape: f32[256,128], index: 13, kind: input, shape index: {}]   ;;  %s2646_s14 = inlined_call_operand.vmem [shape: f32[1,128], index: 14, kind: input, shape index: {}]   ;;  %s2647_s15 = inlined_call_operand.hbm [shape: f32[2,8,128], index: 15, kind: output, shape index: {}]  }
   0x1   :  { %2667 = sst [smem:[#allocation25_spill]] %s2639_s7 }
   0x2   :  { %2668 = sst [smem:[#allocation26_spill]] %s2640_s8 }
   0x3   :  { %2669 = sst [smem:[#allocation27_spill]] %s2642_s10 }
   0x4   :  { %2670 = sst [smem:[#allocation28_spill]] %s2644_s12 }
   0x5   :  { %2671 = sst [smem:[#allocation29_spill]] %s2646_s14 }
   0x6   :  { %2672 = sst [smem:[#allocation30_spill]] %s2647_s15 }
   0x7   :  { %20 = vsyncpa [#allocation3], 0 }
   0x8   :  { %21 = vsyncpa [#allocation6], 0 }
   0x9   :  { %22 = vsyncpa [#allocation9], 0 }
   0xa   :  { %23 = vsyncpa [#allocation4], 0 }
   0xb   :  { %25 = vsyncpa [#allocation4 + $0x1], 0  ;;  %s2307_s18 = smov 0   ;;  %s2309_s19 = smov 0  }
   0xc   :  { %s2311_s20 = smov 0   ;;  %s2313_s21 = smov 0  }
   0xd   :  { %s2315_s22 = smov 0   ;;  %s2317_s23 = smov 0  }
   0xe LB: > { %2673 = sst [smem:[#allocation16_spill]] %s2192_s18  ;;  %s1490_s24 = sadd.s32 4294967295, %s2212_s23   ;;  %s2212_s23 = sphi %s2317_s23, %s31_s23   ;;  %s2208_s22 = sphi %s2315_s22, %s2709_s22   ;;  %s2204_s21 = sphi %s2313_s21, %s2708_s21   ;;  %s2200_s20 = sphi %s2311_s20, %s2707_s20   ;;  %s2196_s19 = sphi %s2309_s19, %s2706_s19   ;;  %s2192_s18 = sphi %s2307_s18, %s2705_s18  }
   0xf   : > { %2674 = sst [smem:[#allocation17_spill]] %s2196_s19  ;;  %s1491_s25 = sadd.s32 4294967294, %s2212_s23  }
  0x10   : > { %2675 = sst [smem:[#allocation18_spill]] %s2200_s20  ;;  %s43_s26 = sadd.s32 1, %s2208_s22 }
  0x11   : > { %2676 = sst [smem:[#allocation19_spill]] %s2208_s22  ;;  %s386_s27 = sadd.s32 1, %s2200_s20 }
  0x12   : > { %2677 = sst [smem:[#allocation20_spill]] %s2212_s23  ;;  %p45_p0 = scmp.ge.s32.totalorder %s43_s26, 2 }
  0x13   : > { %p396_p1 = scmp.ne.s32.totalorder %s2200_s20, %s2196_s19  ;;  %p397_p2 = scmp.eq.s32.totalorder %s1490_s24, 1 }
  0x14   : > { %p402_p3 = scmp.ne.s32.totalorder %s2196_s19, %s2192_s18  ;;  %s2711_s26 = smov (%p45_p0, %s43_s26), 0 }
  0x15   : > { %2678 = sst [smem:[#allocation21_spill]] %s2711_s26  ;;  %p2347_p4 = por %p397_p2, %p396_p1 }
  0x16   : > { %p403_p5 = scmp.eq.s32.totalorder %s1491_s25, 1  ;;  %s381_s29 = ssub.s32 %s2208_s22, %s2711_s26 }
  0x17   : > { %s2679_s28 = scalar_select %p2347_p4, 1, 0 }
  0x18   : > { %p1492_p6 = scmp.ge.s32.totalorder %s2212_s23, 1  ;;  %p384_p7 = scmp.eq.s32.totalorder %s381_s29, 0 }
  0x19   : > { %2680 = sst [smem:[#allocation22_spill]] %s2679_s28  ;;  %p2354_p8 = por %p403_p5, %p402_p3 }
  0x1a   : > { %p410_p9 = scmp.lt.s32.totalorder %s2212_s23, 3  ;;  %p2366_p11 = scmp.eq.s32.totalorder %s1490_s24, 0 }
  0x1b   : > { %s2681_s30 = scalar_select %p2354_p8, 1, 0 }
  0x1c   : > { %s2360_s16 = scalar_select %p384_p7, %s2200_s20, %s386_s27  }
  0x1d   : > { %2682 = sst [smem:[#allocation23_spill]] %s2681_s30  ;;  %p2362_p10 = pnand %p1492_p6, %p410_p9 }
  0x1e   : > { %2683 = sst [smem:[#allocation24_spill]] %s2360_s16  ;;  %s2214_s25 = smov [#allocation5]  }
  0x1f   : > { %s2684_s17 = scalar_select %p2362_p10, 1, 0 }
  0x20   : > { %s2685_s18 = scalar_select %p2366_p11, 1, 0 }
  0x21   : > { %p1887_p12 = pneg %p2362_p10  ;;  %s444_s29 = sshll.u32 %s2214_s25, 4  ;;  %s445_s29 = int_to_ptr.vmem [resolvable:$true] %s444_s29 }
  0x22   : > { %s2215_s27 = smov [#allocation8]   ;;  %s2687_s7 = sld [smem:[#allocation25_spill]] }
  0x23   : > { %p2374_p13 = pnand %p2366_p11, %p1887_p12  ;;  %s476_s22 = sshll.u32 %s2215_s27, 4  ;;  %s2378_s22 = int_to_ptr.vmem [resolvable:$true] %s476_s22 }
  0x25   : > { %p2388_p1 = pneg %p2374_p13 }
  0x28   : > { %s1982_s20 = scalar_lea.hbm %s2687_s7, 2048 }
  0x29   : > { %p1983_p0 = scmp.ne.s32.totalorder %s2687_s7, %s1982_s20  ;;  %p1989_p5 = scmp.lt.u32.totalorder %s1982_s20, %s2687_s7 }
  0x2b   : > { %p1985_p2 = pnand %p2388_p1, %p1983_p0 }
  0x2d   : > { %p1986_p3 = pneg %p1985_p2 }
  0x2f   : > { %p1991_p6 = pnand %p1989_p5, %p1986_p3 }
  0x31   : > { %1994 = shalt.err (!%p1991_p6)
}
  0x32   : > { %s1995_s16 = scalar_lea.vmem %s445_s29, 2048  ;;  %p2003_p8 = scmp.lt.s32.totalorder %s445_s29, %s445_s29 }
  0x33   : > { %p1996_p7 = scmp.ne.s32.totalorder %s445_s29, %s1995_s16  ;;  %p2004_p4 = scmp.lt.s32.totalorder %s1995_s16, %s1995_s16 }
  0x35   : > { %p1998_p9 = pnand %p1996_p7, %p2388_p1  ;;  %p2005_p11 = por %p2004_p4, %p2003_p8 }
  0x37   : > { %p1999_p12 = pneg %p1998_p9 }
  0x39   : > { %p2006_p10 = pnand %p2005_p11, %p1999_p12 }
  0x3b   : > { %2009 = shalt.err (!%p2006_p10)
}
  0x3c   : > { %s2663_s23 = smov 128   ;;  %s2665_s30 = smov 8  }
  0x3d   : > { %1893 = dma.hbm_to_vmem [thread:$0]  (!%p2374_p13), %s2687_s7, 2048, %s445_s29, [#allocation6], %s2663_s23, %s2663_s23, %s2665_s30  }
  0x3e   : > { %s2010_s28 = scalar_lea.hbm %s2643_s11, 4096 }
  0x3f   : > { %p2011_p4 = scmp.ne.s32.totalorder %s2643_s11, %s2010_s28  ;;  %p2017_p11 = scmp.lt.u32.totalorder %s2010_s28, %s2643_s11 }
  0x41   : > { %p2013_p8 = pnand %p2011_p4, %p2388_p1 }
  0x43   : > { %p2014_p10 = pneg %p2013_p8 }
  0x45   : > { %p2019_p0 = pnand %p2017_p11, %p2014_p10 }
  0x47   : > { %2022 = shalt.err (!%p2019_p0)
}
  0x48   : > { %s2023_s29 = scalar_lea.vmem %s2378_s22, 4096  ;;  %p2031_p6 = scmp.lt.s32.totalorder %s2378_s22, %s2378_s22 }
  0x49   : > { %p2024_p2 = scmp.ne.s32.totalorder %s2378_s22, %s2023_s29  ;;  %p2032_p7 = scmp.lt.s32.totalorder %s2023_s29, %s2023_s29 }
  0x4b   : > { %p2026_p3 = pnand %p2024_p2, %p2388_p1  ;;  %p2033_p9 = por %p2032_p7, %p2031_p6 }
  0x4d   : > { %p2027_p5 = pneg %p2026_p3 }
  0x4f   : > { %p2034_p12 = pnand %p2033_p9, %p2027_p5 }
  0x51   : > { %2037 = shalt.err (!%p2034_p12)
}
  0x52   : > { %s2218_s14 = smov 256   ;;  %s2219_s12 = smov 16  }
  0x53   : > { %1899 = dma.hbm_to_vmem [thread:$0]  (!%p2374_p13), %s2643_s11, 4096, %s2378_s22, [#allocation9], %s2218_s14, %s2218_s14, %s2219_s12  }
  0x54   : > { %s2220_s15 = smov [#allocation2]   ;;  %s2221_s24 = smov [#allocation7]  }
  0x55   : > { %s428_s20 = sshll.u32 %s2220_s15, 4  ;;  %s460_s27 = sshll.u32 %s2221_s24, 4  ;;  %s429_s20 = int_to_ptr.vmem [resolvable:$true] %s428_s20  ;;  %s461_s27 = int_to_ptr.vmem [resolvable:$true] %s460_s27 }
  0x56   : > { %s2038_s23 = scalar_lea.hbm %s2637_s5, 2048 }
  0x57   : > { %p2039_p4 = scmp.ne.s32.totalorder %s2637_s5, %s2038_s23  ;;  %p2045_p11 = scmp.lt.u32.totalorder %s2038_s23, %s2637_s5 }
  0x59   : > { %p2041_p8 = pnand %p2039_p4, %p2388_p1 }
  0x5b   : > { %p2042_p10 = pneg %p2041_p8 }
  0x5d   : > { %p2047_p0 = pnand %p2045_p11, %p2042_p10 }
  0x5f   : > { %2050 = shalt.err (!%p2047_p0)
}
  0x60   : > { %s2051_s22 = scalar_lea.vmem %s429_s20, 2048  ;;  %p2059_p6 = scmp.lt.s32.totalorder %s429_s20, %s429_s20 }
  0x61   : > { %p2052_p2 = scmp.ne.s32.totalorder %s429_s20, %s2051_s22  ;;  %p2060_p7 = scmp.lt.s32.totalorder %s2051_s22, %s2051_s22 }
  0x63   : > { %p2054_p3 = pnand %p2052_p2, %p2388_p1  ;;  %p2061_p9 = por %p2060_p7, %p2059_p6 }
  0x65   : > { %p2055_p5 = pneg %p2054_p3 }
  0x67   : > { %p2062_p12 = pnand %p2061_p9, %p2055_p5 }
  0x69   : > { %2065 = shalt.err (!%p2062_p12)
}
  0x6a   : > { %s2689_s7 = smov 8   ;;  %s2690_s30 = smov 128  }
  0x6b   : > { %1890 = dma.hbm_to_vmem [thread:$0]  (!%p2374_p13), %s2637_s5, 2048, %s429_s20, [#allocation3], %s2690_s30, %s2690_s30, %s2689_s7  }
  0x6c   : > { %s2066_s12 = scalar_lea.hbm %s2641_s9, 2048 }
  0x6d   : > { %p2067_p4 = scmp.ne.s32.totalorder %s2641_s9, %s2066_s12  ;;  %p2073_p11 = scmp.lt.u32.totalorder %s2066_s12, %s2641_s9 }
  0x6f   : > { %p2069_p8 = pnand %p2067_p4, %p2388_p1 }
  0x71   : > { %p2070_p10 = pneg %p2069_p8 }
  0x73   : > { %p2075_p0 = pnand %p2073_p11, %p2070_p10 }
  0x75   : > { %2078 = shalt.err (!%p2075_p0)
}
  0x76   : > { %s2079_s16 = scalar_lea.vmem %s461_s27, 2048  ;;  %p2087_p6 = scmp.lt.s32.totalorder %s461_s27, %s461_s27 }
  0x77   : > { %p2080_p2 = scmp.ne.s32.totalorder %s461_s27, %s2079_s16  ;;  %p2088_p7 = scmp.lt.s32.totalorder %s2079_s16, %s2079_s16 }
  0x79   : > { %p2082_p3 = pnand %p2080_p2, %p2388_p1  ;;  %p2089_p9 = por %p2088_p7, %p2087_p6 }
  0x7b   : > { %p2083_p5 = pneg %p2082_p3 }
  0x7d   : > { %p2090_p12 = pnand %p2089_p9, %p2083_p5 }
  0x7f   : > { %2093 = shalt.err (!%p2090_p12)
}
  0x80   : > { %1896 = dma.hbm_to_vmem [thread:$0]  (!%p2374_p13), %s2641_s9, 2048, %s461_s27, [#allocation6], %s2690_s30, %s2690_s30, %s2689_s7  }
  0x81   : > { %s2222_s22 = smov [#allocation10]   ;;  %s2094_s14 = scalar_lea.hbm %s2645_s13, 4096 }
  0x82   : > { %s492_s8 = sshll.u32 %s2222_s22, 4  ;;  %p2095_p4 = scmp.ne.s32.totalorder %s2645_s13, %s2094_s14  ;;  %s493_s8 = int_to_ptr.vmem [resolvable:$true] %s492_s8 }
  0x83   : > { %p2101_p11 = scmp.lt.u32.totalorder %s2094_s14, %s2645_s13 }
  0x84   : > { %p2097_p8 = pnand %p2095_p4, %p2388_p1 }
  0x86   : > { %p2098_p10 = pneg %p2097_p8 }
  0x88   : > { %p2103_p0 = pnand %p2101_p11, %p2098_p10 }
  0x8a   : > { %2106 = shalt.err (!%p2103_p0)
}
  0x8b   : > { %s2107_s27 = scalar_lea.vmem %s493_s8, 4096  ;;  %p2115_p6 = scmp.lt.s32.totalorder %s493_s8, %s493_s8 }
  0x8c   : > { %p2108_p2 = scmp.ne.s32.totalorder %s493_s8, %s2107_s27  ;;  %p2116_p7 = scmp.lt.s32.totalorder %s2107_s27, %s2107_s27 }
  0x8e   : > { %p2110_p3 = pnand %p2108_p2, %p2388_p1  ;;  %p2117_p9 = por %p2116_p7, %p2115_p6 }
  0x90   : > { %p2111_p5 = pneg %p2110_p3 }
  0x92   : > { %p2118_p12 = pnand %p2117_p9, %p2111_p5 }
  0x94   : > { %2121 = shalt.err (!%p2118_p12)
}
  0x95   : > { %1902 = dma.hbm_to_vmem [thread:$0]  (!%p2374_p13), %s2645_s13, 4096, %s493_s8, [#allocation9], %s2690_s30, %s2690_s30, %s2689_s7  }
  0x96   : > { %p2691_p4 = scmp.ne.s32.totalorder %s2684_s17, 0 }
  0x97   : > { %p2692_p1 = scmp.ne.s32.totalorder (!%p2691_p4), %s2685_s18, 0 }
  0x98   : > { %537 = sbr.rel (%p2691_p4) target bundleno = 1530 (0x5fa), region = 80 }
  0x9f   : > { %2175 = dma.done.wait (%p2692_p1), [#allocation3], 2048  }
  0xa0   : > { %2177 = vsyncadd (%p2692_p1), [#allocation3], 4294965248 }
  0xa1   : > { %2179 = dma.done.wait (%p2692_p1), [#allocation6], 4096  }
  0xa2   : > { %2181 = vsyncadd (%p2692_p1), [#allocation6], 4294963200 }
  0xa3   : > { %2183 = dma.done.wait (%p2692_p1), [#allocation9], 8192  }
  0xa4   : > { %2185 = vsyncadd (%p2692_p1), [#allocation9], 4294959104  ;;  %p613_p13 = scmp.lt.s32.totalorder %s2204_s21, 1  ;;  %v2223_v0 = vmov 0.0   ;;  %vm2224_vm0 = vmmov 0   ;;  %v2225_v1 = vmov 0.0|0.0  }
  0xa5   : > { %1611 = vmatprep.subr.mxu0 %v2223_v0  ;;  %1613 = vmatprep.mubr.msk.f32.mxu0 %vm2224_vm0, %v2223_v0  ;;  %vm643_vm1 = vcmask 1043456   ;;  %vm639_vm2 = vcmask 31744   ;;  %v631_v2 = vld [vmem:[%s2635_s3] sm:$0xf]  ;;  %vm723_vm3 = vcmask 1044480   ;;  %v799_v5 = vld [vmem:[#allocation2] sm:$0xff] }
  0xa6   : > { %s2512_s26 = scalar_select %p613_p13, %s2204_s21, 1  ;;  %1726 = vmatprep.subr.bf16.mxu1 %v2225_v1  ;;  %1653 = vmatprep.mubr.msk.f32.mxu1 %vm2224_vm0, %v2223_v0  ;;  %v718_v4 = vld [vmem:[%s2636_s4] sm:$0x1f]  ;;  %v800_v6 = vld [vmem:[#allocation2 + $0x8] sm:$0xff]  ;;  %v802_v9 = vld [vmem:[#allocation2 + $0x18] sm:$0xff]  ;;  %vm719_vm4 = vcmask 39936  }
  0xa7   : > { %1612 = vmatpush3.msk.msra.mxu0 %vm643_vm1, %v631_v2  ;;  %v1727_v7 = vpack.c.bf16 %v800_v6, %v799_v5  ;;  %v801_v8 = vld [vmem:[#allocation2 + $0x10] sm:$0xff]  ;;  %v803_v11 = vld [vmem:[#allocation2 + $0x20] sm:$0xff]  ;;  %v804_v12 = vld [vmem:[#allocation2 + $0x28] sm:$0xff]  ;;  %s2693_s16 = sld [smem:[#allocation26_spill]]  ;;  %s2694_s17 = sld [smem:[#allocation27_spill]] }
  0xa8   : > { %s1506_s18 = sshll.u32 %s2512_s26, 3  ;;  %1616 = vmatprep.subr.mxu0 %v2223_v0  ;;  %v1730_v10 = vpack.c.bf16 %v802_v9, %v801_v8  ;;  %v1733_v14 = vpack.c.bf16 %v804_v12, %v803_v11  ;;  %v805_v15 = vld [vmem:[#allocation2 + $0x30] sm:$0xff]  ;;  %v806_v16 = vld [vmem:[#allocation2 + $0x38] sm:$0xff]  ;;  %v807_v18 = vld [vmem:[#allocation2 + $0x40] sm:$0xff]  ;;  %s629_s19 = scalar_lea.vmem %s2634_s2, %s2512_s26 }
  0xa9   : > { %s619_s7 = scalar_lea.vmem %s2632_s0, %s1506_s18  ;;  %s626_s23 = scalar_lea.vmem %s2633_s1, %s1506_s18  ;;  %1728 = vmatpush3.bf16.msra.mxu1 %v1727_v7  ;;  %v1736_v17 = vpack.c.bf16 %v806_v16, %v805_v15  ;;  %v808_v19 = vld [vmem:[#allocation2 + $0x48] sm:$0xff]  ;;  %v809_v21 = vld [vmem:[#allocation2 + $0x50] sm:$0xff]  ;;  %v810_v22 = vld [vmem:[#allocation2 + $0x58] sm:$0xff] }
  0xaa   : > { %v630_v3 = vld [vmem:[%s619_s7] sm:$0xff]  ;;  %1729 = vmatprep.subr.bf16.mxu1 %v2225_v1  ;;  %v1739_v20 = vpack.c.bf16 %v808_v19, %v807_v18  ;;  %v1742_v23 = vpack.c.bf16 %v810_v22, %v809_v21  ;;  %v811_v24 = vld [vmem:[#allocation2 + $0x60] sm:$0xff]  ;;  %v812_v25 = vld [vmem:[#allocation2 + $0x68] sm:$0xff]  ;;  %s2695_s30 = sld [smem:[#allocation28_spill]]  ;;  %s2696_s20 = sld [smem:[#allocation17_spill]] }
  0xab   : > { %1614 = vmatmul.mubr.msk.f32.vlgmr.msra.gmra.mrb[0].mxu0 %vm639_vm2, %v630_v3  ;;  %v717_v13 = vld [vmem:[%s626_s23] sm:$0xff]  ;;  %v1745_v26 = vpack.c.bf16 %v812_v25, %v811_v24  ;;  %v814_v28 = vld [vmem:[#allocation2 + $0x78] sm:$0xff]  ;;  %v893_v30 = vld [vmem:[#allocation5] sm:$0xff]  ;;  %s2697_s8 = sld [smem:[#allocation29_spill]]  ;;  %s2698_s14 = sld [smem:[#allocation22_spill]] }
  0xac   : > { %1617 = vmatpush3.msk.msra.mxu0 %vm723_vm3, %v718_v4  ;;  %1618 = vmatprep.mubr.msk.f32.mxu0 %vm2224_vm0, %v2223_v0  ;;  %v813_v27 = vld [vmem:[#allocation2 + $0x70] sm:$0xff]  ;;  %v894_v31 = vld [vmem:[#allocation5 + $0x8] sm:$0xff]  ;;  %v896_v34 = vld [vmem:[#allocation5 + $0x18] sm:$0xff]  ;;  %s1518_s12 = sshll.u32 %s2204_s21, 7  ;;  %s2699_s24 = sld [smem:[#allocation30_spill]] }
  0xad   : > { %1750 = vmatprep.subr.bf16.mxu0 %v2225_v1  ;;  %1731 = vmatpush3.bf16.msra.mxu1 %v1730_v10  ;;  %v1748_v29 = vpack.c.bf16 %v814_v28, %v813_v27  ;;  %v895_v32 = vld [vmem:[#allocation5 + $0x10] sm:$0xff]  ;;  %v1751_v33 = vpack.c.bf16 %v894_v31, %v893_v30  ;;  %v897_v36 = vld [vmem:[#allocation5 + $0x20] sm:$0xff]  ;;  %v898_v37 = vld [vmem:[#allocation5 + $0x28] sm:$0xff]  ;;  %s2226_s21 = smov [#allocation11]  }
  0xae   : > { %1732 = vmatprep.subr.bf16.mxu1 %v2225_v1  ;;  %v1754_v35 = vpack.c.bf16 %v896_v34, %v895_v32  ;;  %v1757_v38 = vpack.c.bf16 %v898_v37, %v897_v36  ;;  %v899_v39 = vld [vmem:[#allocation5 + $0x30] sm:$0xff]  ;;  %v900_v40 = vld [vmem:[#allocation5 + $0x38] sm:$0xff]  ;;  %v901_v42 = vld [vmem:[#allocation5 + $0x40] sm:$0xff] }
  0xaf   : > { %v1760_v41 = vpack.c.bf16 %v900_v40, %v899_v39  ;;  %v902_v43 = vld [vmem:[#allocation5 + $0x48] sm:$0xff]  ;;  %v903_v45 = vld [vmem:[#allocation5 + $0x50] sm:$0xff]  ;;  %v904_v46 = vld [vmem:[#allocation5 + $0x58] sm:$0xff] }
  0xb0   : > { %v1763_v44 = vpack.c.bf16 %v902_v43, %v901_v42  ;;  %v1766_v47 = vpack.c.bf16 %v904_v46, %v903_v45  ;;  %v905_v48 = vld [vmem:[#allocation5 + $0x60] sm:$0xff]  ;;  %v906_v49 = vld [vmem:[#allocation5 + $0x68] sm:$0xff]  ;;  %v1508_v51 = vld [vmem:[%s629_s19] ss:$0 sm:$0xff]  ;;  %s610_s10 = sand.u32 1, %s2696_s20  }
  0xb1   : > { %1734 = vmatpush3.bf16.msra.mxu1 %v1733_v14  ;;  %v1769_v50 = vpack.c.bf16 %v906_v49, %v905_v48  ;;  %v907_v56 = vld [vmem:[#allocation5 + $0x70] sm:$0xff]  ;;  %v908_v57 = vld [vmem:[#allocation5 + $0x78] sm:$0xff]  ;;  %v987_v59 = vld [vmem:[#allocation7] sm:$0xff]  ;;  %s1505_s23 = sshll.u32 %s610_s10, 3  ;;  %s1331_s26 = scalar_lea.sflag [#allocation4], %s610_s10 }
  0xb2   : > { %1735 = vmatprep.subr.bf16.mxu1 %v2225_v1  ;;  %v1772_v58 = vpack.c.bf16 %v908_v57, %v907_v56  ;;  %v988_v60 = vld [vmem:[#allocation7 + $0x8] sm:$0xff]  ;;  %v989_v61 = vld [vmem:[#allocation7 + $0x10] sm:$0xff]  ;;  %v990_v63 = vld [vmem:[#allocation7 + $0x18] sm:$0xff]  ;;  %s612_s19 = scalar_lea.vmem [#allocation11], %s1505_s23  ;;  %p2700_p10 = scmp.ne.s32.totalorder %s2698_s14, 0 }
  0xb3   : > { %1619 = vmatmul.mubr.msk.f32.vlgmr.msra.gmra.mrb[0].mxu0 %vm719_vm4, %v717_v13  ;;  %v1775_v62 = vpack.c.bf16 %v988_v60, %v987_v59  ;;  %v1778_v2 = vpack.c.bf16 %v990_v63, %v989_v61  ;;  %v991_v3 = vld [vmem:[#allocation7 + $0x20] sm:$0xff]  ;;  %v992_v4 = vld [vmem:[#allocation7 + $0x28] sm:$0xff]  ;;  %v993_v6 = vld [vmem:[#allocation7 + $0x30] sm:$0xff]  ;;  %s1345_s28 = sshll.u32 %s612_s19, 4  ;;  %s2587_s28 = int_to_ptr.vmem [resolvable:$true] %s1345_s28 }
  0xb4   : > { %1688 = vmatprep.mubr.msk.f32.mxu0 %vm2224_vm0, %v2223_v0  ;;  %1752 = vmatpush3.bf16.msra.mxu0 %v1751_v33  ;;  %v1781_v5 = vpack.c.bf16 %v992_v4, %v991_v3  ;;  %v994_v7 = vld [vmem:[#allocation7 + $0x38] sm:$0xff]  ;;  %v995_v9 = vld [vmem:[#allocation7 + $0x40] sm:$0xff]  ;;  %v996_v10 = vld [vmem:[#allocation7 + $0x48] sm:$0xff]  ;;  %s2122_s18 = scalar_lea.vmem %s2587_s28, 128 }
  0xb5   : > { %1737 = vmatpush3.bf16.msra.mxu1 %v1736_v17  ;;  %1753 = vmatprep.subr.bf16.mxu0 %v2225_v1  ;;  %v1784_v8 = vpack.c.bf16 %v994_v7, %v993_v6  ;;  %v1787_v11 = vpack.c.bf16 %v996_v10, %v995_v9  ;;  %v997_v12 = vld [vmem:[#allocation7 + $0x50] sm:$0xff]  ;;  %v998_v13 = vld [vmem:[#allocation7 + $0x58] sm:$0xff]  ;;  %v999_v15 = vld [vmem:[#allocation7 + $0x60] sm:$0xff]  ;;  %p2123_p8 = scmp.ne.s32.totalorder %s2587_s28, %s2122_s18 }
  0xb6   : > { %1738 = vmatprep.subr.bf16.mxu1 %v2225_v1  ;;  %v1790_v14 = vpack.c.bf16 %v998_v13, %v997_v12  ;;  %v1000_v16 = vld [vmem:[#allocation7 + $0x68] sm:$0xff]  ;;  %v1513_v18 = vld [vmem:[%s2638_s6] ss:$0 sm:$0xff]  ;;  %v1002_v24 = vld [vmem:[#allocation7 + $0x78] sm:$0xff] }
  0xb7   : > { %v1793_v17 = vpack.c.bf16 %v1000_v16, %v999_v15  ;;  %v1083_v27 = vld [vmem:[#allocation8 + $0x18] sm:$0xff]  ;;  %v1080_v28 = vld [vmem:[#allocation8] sm:$0xff]  ;;  %v1085_v30 = vld [vmem:[#allocation8 + $0x28] sm:$0xff]  ;;  %p2124_p11 = pnand %p2123_p8, %p2700_p10 }
  0xb8   : > { %1755 = vmatpush3.bf16.msra.mxu0 %v1754_v35  ;;  %v1087_v31 = vld [vmem:[#allocation8 + $0x38] sm:$0xff]  ;;  %v1084_v34 = vld [vmem:[#allocation8 + $0x20] sm:$0xff]  ;;  %v1086_v35 = vld [vmem:[#allocation8 + $0x30] sm:$0xff] }
  0xb9   : > { %1740 = vmatpush3.bf16.msra.mxu1 %v1739_v20  ;;  %1756 = vmatprep.subr.bf16.mxu0 %v2225_v1  ;;  %v1802_v33 = vpack.c.bf16 %v1087_v31, %v1085_v30  ;;  %v1089_v36 = vld [vmem:[#allocation8 + $0x48] sm:$0xff]  ;;  %v1091_v37 = vld [vmem:[#allocation8 + $0x58] sm:$0xff]  ;;  %v1088_v39 = vld [vmem:[#allocation8 + $0x40] sm:$0xff]  ;;  %p2125_p0 = pneg %p2124_p11 }
  0xba   : > { %1741 = vmatprep.subr.bf16.mxu1 %v2225_v1  ;;  %v1090_v40 = vld [vmem:[#allocation8 + $0x50] sm:$0xff]  ;;  %v1095_v42 = vld [vmem:[#allocation8 + $0x78] sm:$0xff]  ;;  %v1092_v45 = vld [vmem:[#allocation8 + $0x60] sm:$0xff] }
  0xbb   : > { %v1808_v43 = vpack.c.bf16 %v1090_v40, %v1088_v39  ;;  %v1094_v46 = vld [vmem:[#allocation8 + $0x70] sm:$0xff]  ;;  %v1099_v48 = vld [vmem:[#allocation8 + $0x98] sm:$0xff]  ;;  %v1100_v57 = vld [vmem:[#allocation8 + $0xa0] sm:$0xff] }
  0xbc   : > { %1758 = vmatpush3.bf16.msra.mxu0 %v1757_v38  ;;  %v1806_v38 = vpack.c.bf16 %v1091_v37, %v1089_v36  ;;  %v1812_v49 = vpack.c.bf16 %v1094_v46, %v1092_v45  ;;  %v1105_v59 = vld [vmem:[#allocation8 + $0xc8] sm:$0xff]  ;;  %v1107_v60 = vld [vmem:[#allocation8 + $0xd8] sm:$0xff]  ;;  %v1104_v63 = vld [vmem:[#allocation8 + $0xc0] sm:$0xff] }
  0xbd   : > { %1743 = vmatpush3.bf16.msra.mxu1 %v1742_v23  ;;  %1759 = vmatprep.subr.bf16.mxu0 %v2225_v1  ;;  %v1001_v23 = vld [vmem:[#allocation7 + $0x70] sm:$0xff]  ;;  %v1109_v3 = vld [vmem:[#allocation8 + $0xe8] sm:$0xff]  ;;  %v1111_v4 = vld [vmem:[#allocation8 + $0xf8] sm:$0xff] }
  0xbe   : > { %1744 = vmatprep.subr.bf16.mxu1 %v2225_v1  ;;  %v1796_v25 = vpack.c.bf16 %v1002_v24, %v1001_v23  ;;  %v1826_v6 = vpack.c.bf16 %v1111_v4, %v1109_v3  ;;  %v1514_v7 = vld [vmem:[%s2693_s16] ss:$0 sm:$0xff]  ;;  %v1108_v12 = vld [vmem:[#allocation8 + $0xe0] sm:$0xff]  ;;  %v1214_v16 = vld [vmem:[#allocation10 + $0x88] sm:$0xff]  ;;  %v1114_v3 = vlaneseq  ;;  %s2585_s16 = scalar_lea.hbm %s2699_s24, %s1518_s12 }
  0xbf   : > { %v1110_v13 = vld [vmem:[#allocation8 + $0xf0] sm:$0xff]  ;;  %v1213_v15 = vld [vmem:[#allocation10 + $0x80] sm:$0xff]  ;;  %v1202_v30 = vld [vmem:[#allocation10 + $0x28] sm:$0xff] }
  0xc0   : > { %1761 = vmatpush3.bf16.msra.mxu0 %v1760_v41  ;;  %v1093_v41 = vld [vmem:[#allocation8 + $0x68] sm:$0xff]  ;;  %v1199_v24 = vld [vmem:[#allocation10 + $0x10] sm:$0xff]  ;;  %v1204_v36 = vld [vmem:[#allocation10 + $0x38] sm:$0xff]  ;;  %v1115_v4 = vshrl.u32 %v1114_v3, 7 }
  0xc1   : > { %1746 = vmatpush3.bf16.msra.mxu1 %v1745_v26  ;;  %1762 = vmatprep.subr.bf16.mxu0 %v2225_v1  ;;  %v1081_v26 = vld [vmem:[#allocation8 + $0x8] sm:$0xff]  ;;  %v1219_v31 = vld [vmem:[#allocation10 + $0xb0] sm:$0xff]  ;;  %v1221_v37 = vld [vmem:[#allocation10 + $0xc0] sm:$0xff] }
  0xc2   : > { %1747 = vmatprep.subr.bf16.mxu1 %v2225_v1  ;;  %v1205_v40 = vld [vmem:[#allocation10 + $0x40] sm:$0xff]  ;;  %v1207_v46 = vld [vmem:[#allocation10 + $0x50] sm:$0xff] }
  0xc4   : > { %1764 = vmatpush3.bf16.msra.mxu0 %v1763_v44  ;;  %v1810_v44 = vpack.c.bf16 %v1095_v42, %v1093_v41  ;;  %v1206_v41 = vld [vmem:[#allocation10 + $0x48] sm:$0xff]  ;;  %v1223_v42 = vld [vmem:[#allocation10 + $0xd0] sm:$0xff] }
  0xc5   : > { %1749 = vmatpush3.bf16.msra.mxu1 %v1748_v29  ;;  %1765 = vmatprep.subr.bf16.mxu0 %v2225_v1  ;;  %v1798_v29 = vpack.c.bf16 %v1083_v27, %v1081_v26  ;;  %v1217_v26 = vld [vmem:[#allocation10 + $0xa0] sm:$0xff]  ;;  %v1218_v27 = vld [vmem:[#allocation10 + $0xa8] sm:$0xff] }
  0xc6   : > { %1774 = vmatprep.subr.bf16.mxu1 %v2225_v1 }
  0xc8   : > { %1767 = vmatpush3.bf16.msra.mxu0 %v1766_v47  ;;  %v1097_v47 = vld [vmem:[#allocation8 + $0x88] sm:$0xff] }
  0xc9   : > { %1768 = vmatprep.subr.bf16.mxu0 %v2225_v1 }
  0xcc   : > { %1770 = vmatpush3.bf16.msra.mxu0 %v1769_v50  ;;  %v1814_v50 = vpack.c.bf16 %v1099_v48, %v1097_v47  ;;  %v1208_v47 = vld [vmem:[#allocation10 + $0x58] sm:$0xff]  ;;  %v1225_v48 = vld [vmem:[#allocation10 + $0xe0] sm:$0xff] }
  0xcd   : > { %1771 = vmatprep.subr.bf16.mxu0 %v2225_v1 }
  0xd0   : > { %1773 = vmatpush3.bf16.msra.mxu0 %v1772_v58  ;;  %v1102_v58 = vld [vmem:[#allocation8 + $0xb0] sm:$0xff] }
  0xd1   : > { %1799 = vmatprep.subr.bf16.mxu0 %v1798_v29  ;;  %v1820_v61 = vpack.c.bf16 %v1102_v58, %v1100_v57  ;;  %v1838_v29 = vpack.c.bf16 %v1218_v27, %v1217_v26  ;;  %v1210_v57 = vld [vmem:[#allocation10 + $0x68] sm:$0xff] }
 0x186   : > { %v793_v52 = vpop.f32.mrb[0].mxu0 }
 0x187   : > { %v1862_v53 = vadd.f32 %v1508_v51, %v793_v52  ;;  %v1620_v54 = vpop.f32.mrb[1].mxu0  ;;  %v1096_v51 = vld [vmem:[#allocation8 + $0x80] sm:$0xff]  ;;  %v1098_v52 = vld [vmem:[#allocation8 + $0x90] sm:$0xff] }
 0x188   : > { %v1103_v54 = vld [vmem:[#allocation8 + $0xb8] sm:$0xff] }
 0x189   : > { %v798_v55 = vmax.f32 %v1862_v53, 0.0  ;;  %v1101_v53 = vld [vmem:[#allocation8 + $0xa8] sm:$0xff] }
 0x18a   : > { %v1818_v56 = vpack.c.bf16 %v1103_v54, %v1101_v53 }
 0x18b   : > { %1654 = vmatmul.mubr.f32.vlgmr.msra.gmra.mrb[0].mxu1 %v798_v55  ;;  %v1816_v55 = vpack.c.bf16 %v1098_v52, %v1096_v51  ;;  %v1515_v52 = vld [vmem:[%s2694_s17] ss:$0 sm:$0xff]  ;;  %s2126_s17 = sshll.u32 %s2226_s21, 4  ;;  %s2127_s17 = int_to_ptr.vmem [resolvable:$false] %s2126_s17 }
 0x18c   : > { %1723 = vmatprep.mubr.msk.f32.mxu1 %vm2224_vm0, %v2223_v0  ;;  %1776 = vmatpush3.bf16.msra.mxu1 %v1775_v62  ;;  %v1822_v62 = vpack.c.bf16 %v1107_v60, %v1105_v59  ;;  %v1227_v59 = vld [vmem:[#allocation10 + $0xf0] sm:$0xff]  ;;  %v1228_v60 = vld [vmem:[#allocation10 + $0xf8] sm:$0xff]  ;;  %s2128_s25 = scalar_lea.vmem %s2127_s17, 256  ;;  %p2129_p2 = scmp.lt.s32.totalorder %s2587_s28, %s2127_s17 }
 0x18d   : > { %1777 = vmatprep.subr.bf16.mxu1 %v2225_v1  ;;  %p2130_p3 = scmp.lt.s32.totalorder %s2128_s25, %s2122_s18 }
 0x18f   : > { %p2131_p5 = por %p2130_p3, %p2129_p2 }
 0x190   : > { %1779 = vmatpush3.bf16.msra.mxu1 %v1778_v2  ;;  %v1106_v2 = vld [vmem:[#allocation8 + $0xd0] sm:$0xff] }
 0x191   : > { %1780 = vmatprep.subr.bf16.mxu1 %v2225_v1  ;;  %p2132_p6 = pnand %p2131_p5, %p2125_p0 }
 0x194   : > { %1782 = vmatpush3.bf16.msra.mxu1 %v1781_v5  ;;  %v1824_v5 = vpack.c.bf16 %v1106_v2, %v1104_v63  ;;  %v1212_v63 = vld [vmem:[#allocation10 + $0x78] sm:$0xff] }
 0x195   : > { %1783 = vmatprep.subr.bf16.mxu1 %v2225_v1 }
 0x198   : > { %1785 = vmatpush3.bf16.msra.mxu1 %v1784_v8 }
 0x199   : > { %1786 = vmatprep.subr.bf16.mxu1 %v2225_v1 }
 0x19c   : > { %1788 = vmatpush3.bf16.msra.mxu1 %v1787_v11 }
 0x19d   : > { %1789 = vmatprep.subr.bf16.mxu1 %v2225_v1 }
 0x1a0   : > { %1791 = vmatpush3.bf16.msra.mxu1 %v1790_v14  ;;  %v1828_v14 = vpack.c.bf16 %v1110_v13, %v1108_v12 }
 0x1a1   : > { %1792 = vmatprep.subr.bf16.mxu1 %v2225_v1 }
 0x1a4   : > { %1794 = vmatpush3.bf16.msra.mxu1 %v1793_v17  ;;  %v1197_v17 = vld [vmem:[#allocation10] sm:$0xff] }
 0x1a5   : > { %1795 = vmatprep.subr.bf16.mxu1 %v2225_v1  ;;  %v1082_v1 = vld [vmem:[#allocation8 + $0x10] sm:$0xff] }
 0x1a6   : > { %v1800_v32 = vpack.c.bf16 %v1082_v1, %v1080_v28  ;;  %v1201_v1 = vld [vmem:[#allocation10 + $0x20] sm:$0xff] }
 0x1a8   : > { %1797 = vmatpush3.bf16.msra.mxu1 %v1796_v25  ;;  %v1200_v25 = vld [vmem:[#allocation10 + $0x18] sm:$0xff] }
 0x1a9   : > { %v1836_v28 = vpack.c.bf16 %v1200_v25, %v1199_v24 }
 0x25e   : > { %v888_v19 = vpop.f32.mrb[0].mxu1 }
 0x25f   : > { %v889_v20 = vadd.f32 %v1513_v18, %v888_v19  ;;  %v1655_v21 = vpop.f32.mrb[1].mxu1  ;;  %v1830_v18 = vpack.c.bf16 %v1214_v16, %v1213_v15  ;;  %v1198_v19 = vld [vmem:[#allocation10 + $0x8] sm:$0xff] }
 0x260   : > { %v1216_v21 = vld [vmem:[#allocation10 + $0x98] sm:$0xff] }
 0x261   : > { %v892_v22 = vmax.f32 %v889_v20, 0.0  ;;  %v1215_v20 = vld [vmem:[#allocation10 + $0x90] sm:$0xff]  ;;  %1831 = vmatprep.subr.bf16.mxu1 %v1830_v18 }
 0x262   : > { %v1834_v23 = vpack.c.bf16 %v1216_v21, %v1215_v20 }
 0x263   : > { %1689 = vmatmul.mubr.f32.vlgmr.msra.gmra.mrb[2].mxu0 %v892_v22  ;;  %v1832_v22 = vpack.c.bf16 %v1198_v19, %v1197_v17  ;;  %v1516_v17 = vld [vmem:[%s2697_s8] ss:$0 sm:$0xff] }
 0x264   : > { %1188 = vmatprep.mubr.f32.mxu0 %v2223_v0  ;;  %1801 = vmatpush1.bf16.msra.mxu0 %v1800_v32  ;;  %v1804_v0 = vpack.c.bf16 %v1086_v35, %v1084_v34  ;;  %v1220_v32 = vld [vmem:[#allocation10 + $0xb8] sm:$0xff]  ;;  %v1203_v35 = vld [vmem:[#allocation10 + $0x30] sm:$0xff] }
 0x265   : > { %1803 = vmatprep.subr.bf16.mxu0 %v1802_v33  ;;  %v1840_v33 = vpack.c.bf16 %v1202_v30, %v1201_v1  ;;  %v1842_v34 = vpack.c.bf16 %v1220_v32, %v1219_v31  ;;  %v1307_v1 = vand.u32 127, %v1114_v3 }
 0x267   : > { %vm1308_vm6 = vcmp.ge.s32.totalorder %v1307_v1, 2  ;;  %vm1309_vm7 = vcmp.lt.s32.totalorder %v1307_v1, 4 }
 0x268   : > { %1805 = vmatpush1.bf16.msra.mxu0 %v1804_v0  ;;  %v1222_v0 = vld [vmem:[#allocation10 + $0xc8] sm:$0xff]  ;;  %vm1310_vm8 = vmand %vm1308_vm6, %vm1309_vm7 }
 0x269   : > { %1807 = vmatprep.subr.bf16.mxu0 %v1806_v38  ;;  %v1844_v38 = vpack.c.bf16 %v1204_v36, %v1203_v35  ;;  %v1846_v39 = vpack.c.bf16 %v1222_v0, %v1221_v37 }
 0x26c   : > { %1809 = vmatpush1.bf16.msra.mxu0 %v1808_v43  ;;  %v1224_v43 = vld [vmem:[#allocation10 + $0xd8] sm:$0xff] }
 0x26d   : > { %1811 = vmatprep.subr.bf16.mxu0 %v1810_v44  ;;  %v1848_v44 = vpack.c.bf16 %v1206_v41, %v1205_v40  ;;  %v1850_v45 = vpack.c.bf16 %v1224_v43, %v1223_v42 }
 0x270   : > { %1813 = vmatpush1.bf16.msra.mxu0 %v1812_v49  ;;  %v1226_v49 = vld [vmem:[#allocation10 + $0xe8] sm:$0xff] }
 0x271   : > { %1815 = vmatprep.subr.bf16.mxu0 %v1814_v50  ;;  %v1852_v50 = vpack.c.bf16 %v1208_v47, %v1207_v46  ;;  %v1854_v51 = vpack.c.bf16 %v1226_v49, %v1225_v48 }
 0x274   : > { %1817 = vmatpush1.bf16.msra.mxu0 %v1816_v55 }
 0x275   : > { %1819 = vmatprep.subr.bf16.mxu0 %v1818_v56  ;;  %v1209_v56 = vld [vmem:[#allocation10 + $0x60] sm:$0xff] }
 0x276   : > { %v1856_v58 = vpack.c.bf16 %v1210_v57, %v1209_v56 }
 0x278   : > { %1821 = vmatpush1.bf16.msra.mxu0 %v1820_v61  ;;  %v1858_v61 = vpack.c.bf16 %v1228_v60, %v1227_v59 }
 0x279   : > { %1823 = vmatprep.subr.bf16.mxu0 %v1822_v62  ;;  %v1211_v62 = vld [vmem:[#allocation10 + $0x70] sm:$0xff] }
 0x27a   : > { %v1860_v2 = vpack.c.bf16 %v1212_v63, %v1211_v62 }
 0x27c   : > { %1825 = vmatpush1.bf16.msra.mxu0 %v1824_v5  ;;  %v1116_v5 = vsub.s32 0, %v1115_v4 }
 0x27d   : > { %1827 = vmatprep.subr.bf16.mxu0 %v1826_v6  ;;  %v1112_v6 = vld [vmem:[%s2695_s30] sm:$0x3] }
 0x280   : > { %1829 = vmatpush1.bf16.msra.mxu0 %v1828_v14 }
 0x336   : > { %v982_v8 = vpop.f32.mrb[2].mxu0 }
 0x337   : > { %v983_v9 = vadd.f32 %v1514_v7, %v982_v8  ;;  %v1690_v10 = vpop.f32.mrb[3].mxu0  ;;  %v1120_v7 = vsub.s32 1, %v1115_v4  ;;  %v1117_v8 = vrot.slane %v1112_v6, %v1116_v5 }
 0x339   : > { %v986_v11 = vmax.f32 %v983_v9, 0.0  ;;  %v1121_v9 = vrot.slane %v1112_v6, %v1120_v7 }
 0x33b   : > { %1724 = vmatmul.mubr.f32.vlgmr.msra.gmra.mrb[2].mxu1 %v986_v11 }
 0x33c   : > { %1833 = vmatpush3.bf16.msra.mxu1 %v1832_v22 }
 0x33d   : > { %1835 = vmatprep.subr.bf16.mxu1 %v1834_v23 }
 0x340   : > { %1837 = vmatpush3.bf16.msra.mxu1 %v1836_v28 }
 0x341   : > { %1839 = vmatprep.subr.bf16.mxu1 %v1838_v29 }
 0x344   : > { %1841 = vmatpush3.bf16.msra.mxu1 %v1840_v33 }
 0x345   : > { %1843 = vmatprep.subr.bf16.mxu1 %v1842_v34 }
 0x348   : > { %1845 = vmatpush3.bf16.msra.mxu1 %v1844_v38 }
 0x349   : > { %1847 = vmatprep.subr.bf16.mxu1 %v1846_v39 }
 0x34c   : > { %1849 = vmatpush3.bf16.msra.mxu1 %v1848_v44 }
 0x34d   : > { %1851 = vmatprep.subr.bf16.mxu1 %v1850_v45 }
 0x350   : > { %1853 = vmatpush3.bf16.msra.mxu1 %v1852_v50 }
 0x351   : > { %1855 = vmatprep.subr.bf16.mxu1 %v1854_v51 }
 0x354   : > { %1857 = vmatpush3.bf16.msra.mxu1 %v1856_v58 }
 0x355   : > { %1859 = vmatprep.subr.bf16.mxu1 %v1858_v61 }
 0x358   : > { %1861 = vmatpush3.bf16.msra.mxu1 %v1860_v2 }
 0x40e   : > { %v1076_v53 = vpop.f32.mrb[2].mxu1 }
 0x40f   : > { %v1077_v54 = vadd.f32 %v1515_v52, %v1076_v53  ;;  %v1725_v55 = vpop.f32.mrb[3].mxu1 }
 0x411   : > { %1189 = vmatmul.mubr.f32.vlgmr.msra.gmra.mrb[4].mxu0 %v1077_v54 }
 0x4e4   : > { %v1190_v10 = vpop.f32.mrb[4].mxu0 }
 0x4e5   : > { %v1191_v11 = vadd.f32 %v1190_v10, %v1117_v8  ;;  %v1192_v12 = vpop.f32.mrb[5].mxu0 }
 0x4e6   : > { %v1193_v13 = vadd.f32 %v1192_v12, %v1121_v9 }
 0x4e7   : > { %v1195_v15 = vmax.f32 %v1191_v11, 0.0 }
 0x4e8   : > { %v1196_v14 = vmax.f32 %v1193_v13, 0.0 }
 0x4ea   : > { %1300 = vmatprep.mubr.f32.mxu1 %v1196_v14 }
 0x4eb   : > { %1301 = vmatmul.mubr.f32.vlgmr.msra.gmra.mrb[4].mxu1 %v1195_v15 }
 0x5be   : > { %v1608_v16 = vpop.f32.mrb[4].mxu1 }
 0x5bf   : > { %v1609_v18 = vpop.f32.mrb[5].mxu1 }
 0x5c0   : > { %v1610_v19 = vadd.f32 %v1609_v18, %v1608_v16 }
 0x5c2   : > { %v1303_v20 = vadd.f32 %v1610_v19, %v1516_v17 }
 0x5c4   : > { %v1312_v21 = vand.u32 2147483647, %v1303_v20  ;;  %v1311_v32 = vmax.f32 %v1303_v20, 0.0 }
 0x5c6   : > { %v1313_v22 = vsub.f32 0.0, %v1312_v21 }
 0x5c8   : > { %v1314_v23 = vmul.f32 1.442695, %v1313_v22 }
 0x5ca   : > { %1978 = vpow2.f32 %v1314_v23 }
 0x5d4   : > { %v1979_v24 = vpop.eup %1978 }
 0x5d5   : > { %v1316_v25 = vadd.f32 1.0, %v1979_v24  ;;  %v1319_v26 = vmul.f32 -0.5, %v1979_v24  ;;  %v1322_v28 = vand.u32 2147483647, %v1979_v24 }
 0x5d7   : > { %1980 = vlog2.f32 %v1316_v25  ;;  %v1320_v27 = vadd.f32 1.0, %v1319_v26  ;;  %vm1323_vm5 = vcmp.lt.f32.partialorder %v1322_v28, 0.0004427343 }
 0x5d9   : > { %v1321_v31 = vmul.f32 %v1979_v24, %v1320_v27 }
 0x5e1   : > { %v1981_v29 = vpop.eup %1980 }
 0x5e2   : > { %v1318_v30 = vmul.f32 0.6931472, %v1981_v29 }
 0x5e4   : > { %v1324_v33 = vsel %vm1323_vm5, %v1321_v31, %v1318_v30 }
 0x5e5   : > { %v1325_v34 = vadd.f32 %v1324_v33, %v1311_v32 }
 0x5e7   : > { %v1326_v35 = vmul.f32 0.9, %v1325_v34 }
 0x5e9   : > { %v1327_v36 = vadd.f32 0.1, %v1326_v35 }
 0x5eb   : > { %v1328_v37 = vsel %vm1310_vm8, %v1327_v36, %v1303_v20 }
 0x5ec   : > { %1329 = vst [vmem:[%s612_s19] sm:$0xff] %v1328_v37 }
 0x5ed   : > { %2135 = shalt.err (!%p2132_p6)
}
 0x5ee   : > { %s2136_s7 = scalar_lea.hbm %s2585_s16, 128  ;;  %s2140_s29 = scalar_lea.hbm %s2699_s24, 256 }
 0x5ef   : > { %p2137_p7 = scmp.ne.s32.totalorder %s2585_s16, %s2136_s7  ;;  %p2141_p4 = scmp.lt.u32.totalorder %s2585_s16, %s2699_s24 }
 0x5f0   : > { %p2142_p1 = scmp.lt.u32.totalorder %s2140_s29, %s2136_s7  ;;  %p2144_p8 = scmp.lt.u32.totalorder %s2136_s7, %s2585_s16 }
 0x5f1   : > { %p2138_p9 = pnand %p2137_p7, %p2700_p10 }
 0x5f2   : > { %p2143_p13 = por %p2142_p1, %p2141_p4 }
 0x5f3   : > { %p2139_p12 = pneg %p2138_p9 }
 0x5f4   : > { %p2145_p11 = por %p2144_p8, %p2143_p13 }
 0x5f6   : > { %p2146_p0 = pnand %p2145_p11, %p2139_p12 }
 0x5f8   : > { %2149 = shalt.err (!%p2146_p0)
}
 0x5f9   : > { %1885 = dma.vmem_to_hbm [thread:$0]  (%p2700_p10), %s2587_s28, 128, %s2585_s16, %s1331_s26  }
 0x5fa PF: > { %s2701_s10 = sld [smem:[#allocation20_spill]]  ;;  %s2702_s23 = sld [smem:[#allocation16_spill]] }
 0x5fb   : > { %s2703_s12 = sld [smem:[#allocation23_spill]] }
 0x600   : > { %p1917_p2 = scmp.ge.s32.totalorder %s2701_s10, 2  ;;  %s1357_s19 = sand.u32 1, %s2702_s23  }
 0x601   : > { %p2704_p3 = scmp.ne.s32.totalorder %s2703_s12, 0  ;;  %s1358_s15 = scalar_lea.sflag [#allocation4], %s1357_s19 }
 0x603   : > { %p1904_p5 = pnand %p1917_p2, %p2704_p3 }
 0x605   : > { %2187 = dma.done.wait (!%p1904_p5), %s1358_s15, 128  }
 0x606   : > { %2189 = vsyncadd (!%p1904_p5), %s1358_s15, 4294967168  ;;  %s31_s23 = sadd.s32 1, %s2701_s10   ;;  %s2705_s18 = sld [smem:[#allocation17_spill]] }
 0x607   : > { %p28_p6 = scmp.ge.s32.totalorder %s31_s23, 4   ;;  %s2706_s19 = sld [smem:[#allocation18_spill]] }
 0x608   : > { %s2707_s20 = sld [smem:[#allocation24_spill]]  ;;  %s2708_s21 = sld [smem:[#allocation19_spill]] }
 0x609   : > { %s2709_s22 = sld [smem:[#allocation21_spill]]  ;;  %30 = sbr.rel (!%p28_p6) target bundleno = 14 (0xe), region = 142 }
 0x610   :  { %1363 = vsyncpa [#allocation3], 1 }
 0x611   :  { %1365 = vsyncpa [#allocation3 + $0x1], 1 }
 0x612   :  { %1366 = vsyncpa [#allocation6], 1 }
 0x613   :  { %1367 = vsyncpa [#allocation9], 1 }
 0x614   :  { %1368 = vsyncpa [#allocation4], 1 }
 0x615   :  { %1370 = vsyncpa [#allocation4 + $0x1], 1 }

</bundles_post_ra>
